<compile_context>
chip_gen: v7x
topology: tpu7x:2x2x1
jax: 0.10.0
libtpu: 0.0.40
codegen_flags: <defaults>
</compile_context>

<pallas_src>
import functools

import jax
import jax.numpy as jnp
from jax.experimental import pallas as pl
from jax.experimental.pallas import tpu as pltpu


def _stsgcm_fused_kernel(*refs, num_layers, num_nodes, activation, matmul_dtype):
    """refs = (adj, x, [per-layer weight/bias refs...], out)."""
    per_layer = 4 if activation == 'GLU' else 2
    adj_ref = refs[0]
    x_ref = refs[1]
    out_ref = refs[2 + num_layers * per_layer]

    adj = adj_ref[...].astype(matmul_dtype)       # hoisted cast, reused by every layer
    x = x_ref[...]                                # (3N, bb*C0), f32
    running_max = None

    for layer in range(num_layers):               # static unroll; activations stay in VMEM/vregs
        base = 2 + layer * per_layer
        # adj @ X for the whole folded batch in one MXU matmul, f32 accumulation.
        ax = jnp.dot(adj, x.astype(matmul_dtype),
                     preferred_element_type=jnp.float32)          # (3N, bb*C) f32
        axc = ax.astype(matmul_dtype)
        if activation == 'GLU':
            w_lhs = refs[base + 0][...]                           # (bb*C, bb*F) block-diag, matmul dtype
            w_rhs = refs[base + 1][...]
            b_lhs = refs[base + 2][...]                           # (1, bb*F) f32
            b_rhs = refs[base + 3][...]
            h_lhs = jnp.dot(axc, w_lhs, preferred_element_type=jnp.float32) + b_lhs
            h_rhs = jnp.dot(axc, w_rhs, preferred_element_type=jnp.float32) + b_rhs
            y = h_lhs * jax.nn.sigmoid(h_rhs)                     # f32 element-wise (sigmoid -> EUP)
        else:  # relu
            w = refs[base + 0][...]
            b = refs[base + 1][...]
            h = jnp.dot(axc, w, preferred_element_type=jnp.float32) + b
            y = jnp.maximum(h, 0.0)

        mid = y[num_nodes:2 * num_nodes, :]                       # (N, bb*F) static sublane slice
        running_max = mid if running_max is None else jnp.maximum(running_max, mid)
        x = y

    out_ref[...] = running_max.astype(out_ref.dtype)              # single contiguous lane-dense slab


def stsgcm_forward(data, adj, params, activation, *,
                   matmul_dtype=jnp.float32, batch_blocks=1):
    """Stsgcm.forward. data: (B, 3N, C), adj: (3N, 3N). Returns (N, B, F)."""
    B, V3, C = data.shape
    N = V3 // 3
    L = len(params)
    F = params[-1][2]
    assert B % batch_blocks == 0
    bb = B // batch_blocks                 # batches folded into lanes per grid step
    per_layer = 4 if activation == 'GLU' else 2

    # Batch-folded activation layout: x2[v, b*C + c] = data[b, v, c]  (layout plumbing in XLA)
    x2 = jnp.transpose(data, (1, 0, 2)).reshape(V3, B * C)

    def repl(w):   # block-diagonal: one copy of w per folded batch, pre-cast to matmul dtype
        w = w.astype(matmul_dtype)
        return jnp.kron(jnp.eye(bb, dtype=w.dtype), w)

    inputs = [adj, x2]
    in_specs = [
        pl.BlockSpec((V3, V3), lambda i: (0, 0)),        # adj (shared across batch blocks)
        pl.BlockSpec((V3, bb * C), lambda i: (0, i)),    # activations, per batch block
    ]
    for (w_t, bias, f) in params:
        if activation == 'GLU':
            arrs = [repl(w_t[:, :f]), repl(w_t[:, f:]),             # pre-split GLU halves
                    jnp.tile(bias[:, :f], (1, bb)), jnp.tile(bias[:, f:], (1, bb))]
        else:
            arrs = [repl(w_t), jnp.tile(bias, (1, bb))]
        inputs.extend(arrs)
        in_specs.extend(pl.BlockSpec(a.shape, lambda i: (0, 0)) for a in arrs)

    kernel = functools.partial(_stsgcm_fused_kernel, num_layers=L, num_nodes=N,
                               activation=activation, matmul_dtype=matmul_dtype)

    out = pl.pallas_call(
        kernel,
        out_shape=jax.ShapeDtypeStruct((N, B * F), jnp.float32),
        grid_spec=pltpu.PrefetchScalarGridSpec(
            num_scalar_prefetch=0,
            grid=(batch_blocks,),
            in_specs=in_specs,
            out_specs=pl.BlockSpec((N, bb * F), lambda i: (0, i)),
        ),
        compiler_params=pltpu.CompilerParams(
            dimension_semantics=("parallel",)),
    )(*inputs)

    # (N, B*F) slab -> (N, B, F): pure metadata reshape, no transpose needed.
    return out.reshape(N, B, F)


def stsgcm_reference(data, adj, params, activation):
    """Pure-JAX reference mirroring the PyTorch module semantics."""
    N = adj.shape[0] // 3
    mids = []
    x = data
    for (w_t, bias, f) in params:
        ax = jnp.einsum('ij,bjc->bic', adj, x)
        h = ax @ w_t + bias
        if activation == 'GLU':
            lhs, rhs = h[..., :f], h[..., f:]
            x = lhs * jax.nn.sigmoid(rhs)
        else:
            x = jnp.maximum(h, 0.0)
        mids.append(x[:, N:2 * N, :])
    out = jnp.max(jnp.stack(mids, axis=0), axis=0)
    return jnp.transpose(out, (1, 0, 2))


def init_params(key, num_of_features, filters, activation):
    """Deterministic param init. Each layer: Linear(in_dim, F or 2F)."""
    params = []
    in_dim = num_of_features
    for f in filters:
        out_dim = 2 * f if activation == 'GLU' else f
        key, kw, kb = jax.random.split(key, 3)
        # PyTorch Linear weight is (out, in); we store W^T = (in, out) for x @ W^T.
        w = 0.1 * jax.random.normal(kw, (out_dim, in_dim), dtype=jnp.float32)
        b = 0.1 * jax.random.normal(kb, (1, out_dim), dtype=jnp.float32)
        params.append((w.T, b, f))
        in_dim = f
    return params


if __name__ == "__main__":
    # Small shapes: batch=2, num_of_vertices=8 (adj is 24x24), features=4,
    # filters=[16,16,16] (must be equal for the module's cat/max).
    B = 2
    N = 8
    C_IN = 4
    FILTERS = [16, 16, 16]

    key = jax.random.PRNGKey(0)
    key, kd, ka, kp, kp2 = jax.random.split(key, 5)
    data = jax.random.normal(kd, (B, 3 * N, C_IN), dtype=jnp.float32)
    adj = jax.random.uniform(ka, (3 * N, 3 * N), dtype=jnp.float32)

    # GLU path, f32 matmuls.
    params_glu = init_params(kp, C_IN, FILTERS, 'GLU')
    ref_glu = stsgcm_reference(data, adj, params_glu, 'GLU')
    out_glu = jax.block_until_ready(stsgcm_forward(data, adj, params_glu, 'GLU'))
    assert out_glu.shape == (N, B, FILTERS[-1]), out_glu.shape
    assert jnp.allclose(out_glu, ref_glu, rtol=1e-4, atol=1e-4), "GLU f32 mismatch"

    # GLU path, bf16 MXU operands (v6e/v7x), f32 accumulation + f32 GLU math.
    out_bf16 = jax.block_until_ready(
        stsgcm_forward(data, adj, params_glu, 'GLU', matmul_dtype=jnp.bfloat16))
    assert jnp.allclose(out_bf16, ref_glu, rtol=1e-1, atol=1e-1), "GLU bf16 mismatch"

    # relu path, f32.
    params_relu = init_params(kp2, C_IN, FILTERS, 'relu')
    ref_relu = stsgcm_reference(data, adj, params_relu, 'relu')
    out_relu = jax.block_until_ready(stsgcm_forward(data, adj, params_relu, 'relu'))
    assert jnp.allclose(out_relu, ref_relu, rtol=1e-4, atol=1e-4), "relu f32 mismatch"

    print("KERNEL_OK")
</pallas_src>

<mosaic_0001>
module attributes {stable_mosaic.version = 11 : i64} {
  func.func @_stsgcm_fused_kernel(%arg0: i32, %arg1: memref<24x24xf32, #tpu.memory_space<vmem>>, %arg2: memref<24x8xf32, #tpu.memory_space<vmem>>, %arg3: memref<8x32xf32, #tpu.memory_space<vmem>>, %arg4: memref<8x32xf32, #tpu.memory_space<vmem>>, %arg5: memref<1x32xf32, #tpu.memory_space<vmem>>, %arg6: memref<1x32xf32, #tpu.memory_space<vmem>>, %arg7: memref<32x32xf32, #tpu.memory_space<vmem>>, %arg8: memref<32x32xf32, #tpu.memory_space<vmem>>, %arg9: memref<1x32xf32, #tpu.memory_space<vmem>>, %arg10: memref<1x32xf32, #tpu.memory_space<vmem>>, %arg11: memref<32x32xf32, #tpu.memory_space<vmem>>, %arg12: memref<32x32xf32, #tpu.memory_space<vmem>>, %arg13: memref<1x32xf32, #tpu.memory_space<vmem>>, %arg14: memref<1x32xf32, #tpu.memory_space<vmem>>, %arg15: memref<8x32xf32, #tpu.memory_space<vmem>>) attributes {dimension_semantics = [#tpu.dimension_semantics<parallel>], iteration_bounds = array<i64: 1>, scalar_prefetch = 0 : i64, scratch_operands = 0 : i64, tpu.core_type = #tpu.core_type<tc>, window_params = [{pipeline_mode = #tpu.pipeline_mode<synchronous>, transform_indices = @transform_0, window_bounds = array<i64: 24, 24>}, {transform_indices = @transform_1, window_bounds = array<i64: 24, 8>}, {pipeline_mode = #tpu.pipeline_mode<synchronous>, transform_indices = @transform_2, window_bounds = array<i64: 8, 32>}, {pipeline_mode = #tpu.pipeline_mode<synchronous>, transform_indices = @transform_3, window_bounds = array<i64: 8, 32>}, {pipeline_mode = #tpu.pipeline_mode<synchronous>, transform_indices = @transform_4, window_bounds = array<i64: 1, 32>}, {pipeline_mode = #tpu.pipeline_mode<synchronous>, transform_indices = @transform_5, window_bounds = array<i64: 1, 32>}, {pipeline_mode = #tpu.pipeline_mode<synchronous>, transform_indices = @transform_6, window_bounds = array<i64: 32, 32>}, {pipeline_mode = #tpu.pipeline_mode<synchronous>, transform_indices = @transform_7, window_bounds = array<i64: 32, 32>}, {pipeline_mode = #tpu.pipeline_mode<synchronous>, transform_indices = @transform_8, window_bounds = array<i64: 1, 32>}, {pipeline_mode = #tpu.pipeline_mode<synchronous>, transform_indices = @transform_9, window_bounds = array<i64: 1, 32>}, {pipeline_mode = #tpu.pipeline_mode<synchronous>, transform_indices = @transform_10, window_bounds = array<i64: 32, 32>}, {pipeline_mode = #tpu.pipeline_mode<synchronous>, transform_indices = @transform_11, window_bounds = array<i64: 32, 32>}, {pipeline_mode = #tpu.pipeline_mode<synchronous>, transform_indices = @transform_12, window_bounds = array<i64: 1, 32>}, {pipeline_mode = #tpu.pipeline_mode<synchronous>, transform_indices = @transform_13, window_bounds = array<i64: 1, 32>}, {transform_indices = @transform_14, window_bounds = array<i64: 8, 32>}]} {
    %c0 = arith.constant 0 : index
    %c0_0 = arith.constant 0 : index
    %0 = vector.load %arg1[%c0, %c0_0] : memref<24x24xf32, #tpu.memory_space<vmem>>, vector<24x24xf32>
    %c0_1 = arith.constant 0 : index
    %c0_2 = arith.constant 0 : index
    %1 = vector.load %arg2[%c0_1, %c0_2] : memref<24x8xf32, #tpu.memory_space<vmem>>, vector<24x8xf32>
    %cst = arith.constant dense<0.000000e+00> : vector<24x8xf32>
    %2 = tpu.matmul %0, %1, %cst {dimension_numbers = #tpu.dot_dimension_numbers<[1], [0], [0], [1], [0, 0, 1, 1], [], []>} : vector<24x24xf32>, vector<24x8xf32>, vector<24x8xf32> -> vector<24x8xf32>
    %c0_3 = arith.constant 0 : index
    %c0_4 = arith.constant 0 : index
    %3 = vector.load %arg3[%c0_3, %c0_4] : memref<8x32xf32, #tpu.memory_space<vmem>>, vector<8x32xf32>
    %c0_5 = arith.constant 0 : index
    %c0_6 = arith.constant 0 : index
    %4 = vector.load %arg4[%c0_5, %c0_6] : memref<8x32xf32, #tpu.memory_space<vmem>>, vector<8x32xf32>
    %c0_7 = arith.constant 0 : index
    %c0_8 = arith.constant 0 : index
    %5 = vector.load %arg5[%c0_7, %c0_8] : memref<1x32xf32, #tpu.memory_space<vmem>>, vector<1x32xf32>
    %c0_9 = arith.constant 0 : index
    %c0_10 = arith.constant 0 : index
    %6 = vector.load %arg6[%c0_9, %c0_10] : memref<1x32xf32, #tpu.memory_space<vmem>>, vector<1x32xf32>
    %cst_11 = arith.constant dense<0.000000e+00> : vector<24x32xf32>
    %7 = tpu.matmul %2, %3, %cst_11 {dimension_numbers = #tpu.dot_dimension_numbers<[1], [0], [0], [1], [0, 0, 1, 1], [], []>} : vector<24x8xf32>, vector<8x32xf32>, vector<24x32xf32> -> vector<24x32xf32>
    %8 = vector.broadcast %5 : vector<1x32xf32> to vector<24x32xf32>
    %9 = arith.addf %7, %8 : vector<24x32xf32>
    %cst_12 = arith.constant dense<0.000000e+00> : vector<24x32xf32>
    %10 = tpu.matmul %2, %4, %cst_12 {dimension_numbers = #tpu.dot_dimension_numbers<[1], [0], [0], [1], [0, 0, 1, 1], [], []>} : vector<24x8xf32>, vector<8x32xf32>, vector<24x32xf32> -> vector<24x32xf32>
    %11 = vector.broadcast %6 : vector<1x32xf32> to vector<24x32xf32>
    %12 = arith.addf %10, %11 : vector<24x32xf32>
    %13 = arith.negf %12 : vector<24x32xf32>
    %14 = math.exp %13 : vector<24x32xf32>
    %cst_13 = arith.constant 1.000000e+00 : f32
    %15 = vector.broadcast %cst_13 : f32 to vector<24x32xf32>
    %16 = arith.addf %15, %14 : vector<24x32xf32>
    %17 = arith.divf %15, %16 : vector<24x32xf32>
    %18 = arith.mulf %9, %17 : vector<24x32xf32>
    %19 = vector.extract_strided_slice %18 {offsets = [8, 0], sizes = [8, 32], strides = [1, 1]} : vector<24x32xf32> to vector<8x32xf32>
    %cst_14 = arith.constant dense<0.000000e+00> : vector<24x32xf32>
    %20 = tpu.matmul %0, %18, %cst_14 {dimension_numbers = #tpu.dot_dimension_numbers<[1], [0], [0], [1], [0, 0, 1, 1], [], []>} : vector<24x24xf32>, vector<24x32xf32>, vector<24x32xf32> -> vector<24x32xf32>
    %c0_15 = arith.constant 0 : index
    %c0_16 = arith.constant 0 : index
    %21 = vector.load %arg7[%c0_15, %c0_16] : memref<32x32xf32, #tpu.memory_space<vmem>>, vector<32x32xf32>
    %c0_17 = arith.constant 0 : index
    %c0_18 = arith.constant 0 : index
    %22 = vector.load %arg8[%c0_17, %c0_18] : memref<32x32xf32, #tpu.memory_space<vmem>>, vector<32x32xf32>
    %c0_19 = arith.constant 0 : index
    %c0_20 = arith.constant 0 : index
    %23 = vector.load %arg9[%c0_19, %c0_20] : memref<1x32xf32, #tpu.memory_space<vmem>>, vector<1x32xf32>
    %c0_21 = arith.constant 0 : index
    %c0_22 = arith.constant 0 : index
    %24 = vector.load %arg10[%c0_21, %c0_22] : memref<1x32xf32, #tpu.memory_space<vmem>>, vector<1x32xf32>
    %cst_23 = arith.constant dense<0.000000e+00> : vector<24x32xf32>
    %25 = tpu.matmul %20, %21, %cst_23 {dimension_numbers = #tpu.dot_dimension_numbers<[1], [0], [0], [1], [0, 0, 1, 1], [], []>} : vector<24x32xf32>, vector<32x32xf32>, vector<24x32xf32> -> vector<24x32xf32>
    %26 = vector.broadcast %23 : vector<1x32xf32> to vector<24x32xf32>
    %27 = arith.addf %25, %26 : vector<24x32xf32>
    %cst_24 = arith.constant dense<0.000000e+00> : vector<24x32xf32>
    %28 = tpu.matmul %20, %22, %cst_24 {dimension_numbers = #tpu.dot_dimension_numbers<[1], [0], [0], [1], [0, 0, 1, 1], [], []>} : vector<24x32xf32>, vector<32x32xf32>, vector<24x32xf32> -> vector<24x32xf32>
    %29 = vector.broadcast %24 : vector<1x32xf32> to vector<24x32xf32>
    %30 = arith.addf %28, %29 : vector<24x32xf32>
    %31 = arith.negf %30 : vector<24x32xf32>
    %32 = math.exp %31 : vector<24x32xf32>
    %cst_25 = arith.constant 1.000000e+00 : f32
    %33 = vector.broadcast %cst_25 : f32 to vector<24x32xf32>
    %34 = arith.addf %33, %32 : vector<24x32xf32>
    %35 = arith.divf %33, %34 : vector<24x32xf32>
    %36 = arith.mulf %27, %35 : vector<24x32xf32>
    %37 = vector.extract_strided_slice %36 {offsets = [8, 0], sizes = [8, 32], strides = [1, 1]} : vector<24x32xf32> to vector<8x32xf32>
    %38 = arith.maximumf %19, %37 : vector<8x32xf32>
    %cst_26 = arith.constant dense<0.000000e+00> : vector<24x32xf32>
    %39 = tpu.matmul %0, %36, %cst_26 {dimension_numbers = #tpu.dot_dimension_numbers<[1], [0], [0], [1], [0, 0, 1, 1], [], []>} : vector<24x24xf32>, vector<24x32xf32>, vector<24x32xf32> -> vector<24x32xf32>
    %c0_27 = arith.constant 0 : index
    %c0_28 = arith.constant 0 : index
    %40 = vector.load %arg11[%c0_27, %c0_28] : memref<32x32xf32, #tpu.memory_space<vmem>>, vector<32x32xf32>
    %c0_29 = arith.constant 0 : index
    %c0_30 = arith.constant 0 : index
    %41 = vector.load %arg12[%c0_29, %c0_30] : memref<32x32xf32, #tpu.memory_space<vmem>>, vector<32x32xf32>
    %c0_31 = arith.constant 0 : index
    %c0_32 = arith.constant 0 : index
    %42 = vector.load %arg13[%c0_31, %c0_32] : memref<1x32xf32, #tpu.memory_space<vmem>>, vector<1x32xf32>
    %c0_33 = arith.constant 0 : index
    %c0_34 = arith.constant 0 : index
    %43 = vector.load %arg14[%c0_33, %c0_34] : memref<1x32xf32, #tpu.memory_space<vmem>>, vector<1x32xf32>
    %cst_35 = arith.constant dense<0.000000e+00> : vector<24x32xf32>
    %44 = tpu.matmul %39, %40, %cst_35 {dimension_numbers = #tpu.dot_dimension_numbers<[1], [0], [0], [1], [0, 0, 1, 1], [], []>} : vector<24x32xf32>, vector<32x32xf32>, vector<24x32xf32> -> vector<24x32xf32>
    %45 = vector.broadcast %42 : vector<1x32xf32> to vector<24x32xf32>
    %46 = arith.addf %44, %45 : vector<24x32xf32>
    %cst_36 = arith.constant dense<0.000000e+00> : vector<24x32xf32>
    %47 = tpu.matmul %39, %41, %cst_36 {dimension_numbers = #tpu.dot_dimension_numbers<[1], [0], [0], [1], [0, 0, 1, 1], [], []>} : vector<24x32xf32>, vector<32x32xf32>, vector<24x32xf32> -> vector<24x32xf32>
    %48 = vector.broadcast %43 : vector<1x32xf32> to vector<24x32xf32>
    %49 = arith.addf %47, %48 : vector<24x32xf32>
    %50 = arith.negf %49 : vector<24x32xf32>
    %51 = math.exp %50 : vector<24x32xf32>
    %cst_37 = arith.constant 1.000000e+00 : f32
    %52 = vector.broadcast %cst_37 : f32 to vector<24x32xf32>
    %53 = arith.addf %52, %51 : vector<24x32xf32>
    %54 = arith.divf %52, %53 : vector<24x32xf32>
    %55 = arith.mulf %46, %54 : vector<24x32xf32>
    %56 = vector.extract_strided_slice %55 {offsets = [8, 0], sizes = [8, 32], strides = [1, 1]} : vector<24x32xf32> to vector<8x32xf32>
    %57 = arith.maximumf %38, %56 : vector<8x32xf32>
    %c0_38 = arith.constant 0 : index
    %c0_39 = arith.constant 0 : index
    %58 = vector.load %arg15[%c0_38, %c0_39] : memref<8x32xf32, #tpu.memory_space<vmem>>, vector<8x32xf32>
    tpu.vector_store %arg15[%c0_38, %c0_39], %57 {strides = array<i32>} : memref<8x32xf32, #tpu.memory_space<vmem>>, vector<8x32xf32>,
    return
  }
  func.func @transform_0(%arg0: i32) -> (i32, i32) {
    %c0_i32 = arith.constant 0 : i32
    %c0_i32_0 = arith.constant 0 : i32
    %c0_i32_1 = arith.constant 0 : i32
    return %c0_i32, %c0_i32_0 : i32, i32
  }
  func.func @transform_1(%arg0: i32) -> (i32, i32) {
    %c0_i32 = arith.constant 0 : i32
    %c0_i32_0 = arith.constant 0 : i32
    return %c0_i32, %arg0 : i32, i32
  }
  func.func @transform_2(%arg0: i32) -> (i32, i32) {
    %c0_i32 = arith.constant 0 : i32
    %c0_i32_0 = arith.constant 0 : i32
    %c0_i32_1 = arith.constant 0 : i32
    return %c0_i32, %c0_i32_0 : i32, i32
  }
  func.func @transform_3(%arg0: i32) -> (i32, i32) {
    %c0_i32 = arith.constant 0 : i32
    %c0_i32_0 = arith.constant 0 : i32
    %c0_i32_1 = arith.constant 0 : i32
    return %c0_i32, %c0_i32_0 : i32, i32
  }
  func.func @transform_4(%arg0: i32) -> (i32, i32) {
    %c0_i32 = arith.constant 0 : i32
    %c0_i32_0 = arith.constant 0 : i32
    %c0_i32_1 = arith.constant 0 : i32
    return %c0_i32, %c0_i32_0 : i32, i32
  }
  func.func @transform_5(%arg0: i32) -> (i32, i32) {
    %c0_i32 = arith.constant 0 : i32
    %c0_i32_0 = arith.constant 0 : i32
    %c0_i32_1 = arith.constant 0 : i32
    return %c0_i32, %c0_i32_0 : i32, i32
  }
  func.func @transform_6(%arg0: i32) -> (i32, i32) {
    %c0_i32 = arith.constant 0 : i32
    %c0_i32_0 = arith.constant 0 : i32
    %c0_i32_1 = arith.constant 0 : i32
    return %c0_i32, %c0_i32_0 : i32, i32
  }
  func.func @transform_7(%arg0: i32) -> (i32, i32) {
    %c0_i32 = arith.constant 0 : i32
    %c0_i32_0 = arith.constant 0 : i32
    %c0_i32_1 = arith.constant 0 : i32
    return %c0_i32, %c0_i32_0 : i32, i32
  }
  func.func @transform_8(%arg0: i32) -> (i32, i32) {
    %c0_i32 = arith.constant 0 : i32
    %c0_i32_0 = arith.constant 0 : i32
    %c0_i32_1 = arith.constant 0 : i32
    return %c0_i32, %c0_i32_0 : i32, i32
  }
  func.func @transform_9(%arg0: i32) -> (i32, i32) {
    %c0_i32 = arith.constant 0 : i32
    %c0_i32_0 = arith.constant 0 : i32
    %c0_i32_1 = arith.constant 0 : i32
    return %c0_i32, %c0_i32_0 : i32, i32
  }
  func.func @transform_10(%arg0: i32) -> (i32, i32) {
    %c0_i32 = arith.constant 0 : i32
    %c0_i32_0 = arith.constant 0 : i32
    %c0_i32_1 = arith.constant 0 : i32
    return %c0_i32, %c0_i32_0 : i32, i32
  }
  func.func @transform_11(%arg0: i32) -> (i32, i32) {
    %c0_i32 = arith.constant 0 : i32
    %c0_i32_0 = arith.constant 0 : i32
    %c0_i32_1 = arith.constant 0 : i32
    return %c0_i32, %c0_i32_0 : i32, i32
  }
  func.func @transform_12(%arg0: i32) -> (i32, i32) {
    %c0_i32 = arith.constant 0 : i32
    %c0_i32_0 = arith.constant 0 : i32
    %c0_i32_1 = arith.constant 0 : i32
    return %c0_i32, %c0_i32_0 : i32, i32
  }
  func.func @transform_13(%arg0: i32) -> (i32, i32) {
    %c0_i32 = arith.constant 0 : i32
    %c0_i32_0 = arith.constant 0 : i32
    %c0_i32_1 = arith.constant 0 : i32
    return %c0_i32, %c0_i32_0 : i32, i32
  }
  func.func @transform_14(%arg0: i32) -> (i32, i32) {
    %c0_i32 = arith.constant 0 : i32
    %c0_i32_0 = arith.constant 0 : i32
    return %c0_i32, %arg0 : i32, i32
  }
}

</mosaic_0001>

<bundles_post_ra>
// kernel: tpu_custom_call.1
= control target key start
LH: loop header
LB: loop body
LE: loop exit
PB: predicated region body
PF: predicated region fallthrough
CT: control target
= control target key end

     0   :  { %19 = vsyncpa [#allocation3], 0  ;;  %s1880_s0 = inlined_call_operand.hbm [shape: f32[24,24], index: 0, kind: input, shape index: {}]   ;;  %s1881_s1 = inlined_call_operand.vmem [shape: f32[24,8], index: 1, kind: input, shape index: {}]   ;;  %s1882_s2 = inlined_call_operand.hbm [shape: f32[8,32], index: 2, kind: input, shape index: {}]   ;;  %s1883_s3 = inlined_call_operand.hbm [shape: f32[8,32], index: 3, kind: input, shape index: {}]   ;;  %s1884_s4 = inlined_call_operand.vmem [shape: f32[1,32], index: 4, kind: input, shape index: {}]   ;;  %s1885_s5 = inlined_call_operand.vmem [shape: f32[1,32], index: 5, kind: input, shape index: {}]   ;;  %s1886_s6 = inlined_call_operand.vmem [shape: f32[32,32], index: 6, kind: input, shape index: {}]   ;;  %s1887_s7 = inlined_call_operand.hbm [shape: f32[32,32], index: 7, kind: input, shape index: {}]   ;;  %s1888_s8 = inlined_call_operand.hbm [shape: f32[1,32], index: 8, kind: input, shape index: {}]   ;;  %s1889_s9 = inlined_call_operand.hbm [shape: f32[1,32], index: 9, kind: input, shape index: {}]   ;;  %s1890_s10 = inlined_call_operand.vmem [shape: f32[32,32], index: 10, kind: input, shape index: {}]   ;;  %s1891_s11 = inlined_call_operand.hbm [shape: f32[32,32], index: 11, kind: input, shape index: {}]   ;;  %s1892_s12 = inlined_call_operand.vmem [shape: f32[1,32], index: 12, kind: input, shape index: {}]   ;;  %s1893_s13 = inlined_call_operand.vmem [shape: f32[1,32], index: 13, kind: input, shape index: {}]   ;;  %s1894_s14 = inlined_call_operand.hbm [shape: f32[8,32], index: 14, kind: output, shape index: {}]  }
   0x1   :  { %20 = vsyncpa [#allocation6], 0 }
   0x2   :  { %21 = vsyncpa [#allocation9], 0 }
   0x3   :  { %22 = vsyncpa [#allocation12], 0 }
   0x4   :  { %23 = vsyncpa [#allocation4], 0  ;;  %s1519_s29 = smov [#allocation5]   ;;  %s1333_s17 = scalar_lea.hbm %s1882_s2, 128 }
   0x5   :  { %s44_s30 = sshll.u32 %s1519_s29, 4  ;;  %p1334_p0 = scmp.ne.s32.totalorder %s1882_s2, %s1333_s17  ;;  %s45_s30 = int_to_ptr.vmem [resolvable:$true] %s44_s30 }
   0x6   :  { %p1337_p1 = scmp.lt.u32.totalorder %s1333_s17, %s1882_s2 }
   0x8   :  { %p1339_p2 = pnand %p1337_p1, %p1334_p0 }
   0xa   :  { %1342 = shalt.err (!%p1339_p2)
}
   0xb   :  { %s1343_s22 = scalar_lea.vmem %s45_s30, 128  ;;  %p1348_p4 = scmp.lt.s32.totalorder %s45_s30, %s45_s30 }
   0xc   :  { %p1344_p3 = scmp.ne.s32.totalorder %s45_s30, %s1343_s22  ;;  %p1349_p5 = scmp.lt.s32.totalorder %s1343_s22, %s1343_s22 }
   0xe   :  { %p1350_p6 = por %p1349_p5, %p1348_p4 }
  0x10   :  { %p1351_p7 = pnand %p1350_p6, %p1344_p3 }
  0x12   :  { %1354 = shalt.err (!%p1351_p7)
}
  0x13   :  { %47 = dma.hbm_to_vmem [thread:$0]  %s1882_s2, 128, %s45_s30, [#allocation6]  }
  0x14   :  { %s1520_s25 = smov [#allocation8]   ;;  %s1521_s27 = smov [#allocation11]  }
  0x15   :  { %s69_s26 = sshll.u32 %s1520_s25, 4  ;;  %s92_s28 = sshll.u32 %s1521_s27, 4  ;;  %s70_s26 = int_to_ptr.vmem [resolvable:$true] %s69_s26  ;;  %s93_s28 = int_to_ptr.vmem [resolvable:$true] %s92_s28 }
  0x16   :  { %s1355_s16 = scalar_lea.hbm %s1887_s7, 512 }
  0x17   :  { %p1356_p8 = scmp.ne.s32.totalorder %s1887_s7, %s1355_s16  ;;  %p1359_p9 = scmp.lt.u32.totalorder %s1355_s16, %s1887_s7 }
  0x19   :  { %p1361_p10 = pnand %p1359_p9, %p1356_p8 }
  0x1b   :  { %1364 = shalt.err (!%p1361_p10)
}
  0x1c   :  { %s1365_s2 = scalar_lea.vmem %s70_s26, 512  ;;  %p1370_p12 = scmp.lt.s32.totalorder %s70_s26, %s70_s26 }
  0x1d   :  { %p1366_p11 = scmp.ne.s32.totalorder %s70_s26, %s1365_s2  ;;  %p1371_p13 = scmp.lt.s32.totalorder %s1365_s2, %s1365_s2 }
  0x1f   :  { %p1372_p0 = por %p1371_p13, %p1370_p12 }
  0x21   :  { %p1373_p1 = pnand %p1372_p0, %p1366_p11 }
  0x23   :  { %1376 = shalt.err (!%p1373_p1)
}
  0x24   :  { %s1522_s30 = smov 128   ;;  %s1523_s21 = smov 8  }
  0x25   :  { %75 = dma.hbm_to_vmem [thread:$0]  %s1887_s7, 512, %s70_s26, [#allocation9], %s1522_s30, %s1522_s30, %s1523_s21  }
  0x26   :  { %s1377_s27 = scalar_lea.hbm %s1889_s9, 16 }
  0x27   :  { %p1378_p2 = scmp.ne.s32.totalorder %s1889_s9, %s1377_s27  ;;  %p1381_p3 = scmp.lt.u32.totalorder %s1377_s27, %s1889_s9 }
  0x29   :  { %p1383_p4 = pnand %p1381_p3, %p1378_p2 }
  0x2b   :  { %1386 = shalt.err (!%p1383_p4)
}
  0x2c   :  { %s1387_s18 = scalar_lea.vmem %s93_s28, 16  ;;  %s1391_s19 = scalar_lea.vmem %s93_s28, 32 }
  0x2d   :  { %p1388_p5 = scmp.ne.s32.totalorder %s93_s28, %s1387_s18  ;;  %p1392_p6 = scmp.lt.s32.totalorder %s93_s28, %s93_s28 }
  0x2e   :  { %p1393_p7 = scmp.lt.s32.totalorder %s1391_s19, %s1387_s18 }
  0x30   :  { %p1394_p8 = por %p1393_p7, %p1392_p6 }
  0x32   :  { %p1395_p9 = pnand %p1394_p8, %p1388_p5 }
  0x34   :  { %1398 = shalt.err (!%p1395_p9)
}
  0x35   :  { %95 = dma.hbm_to_vmem [thread:$0]  %s1889_s9, 16, %s93_s28, [#allocation12]  }
  0x36   :  { %s1524_s20 = smov [#allocation2]   ;;  %s1525_s22 = smov [#allocation7]  }
  0x37   :  { %s29_s2 = sshll.u32 %s1524_s20, 4  ;;  %s54_s23 = sshll.u32 %s1525_s22, 4  ;;  %s30_s2 = int_to_ptr.vmem [resolvable:$true] %s29_s2  ;;  %s55_s23 = int_to_ptr.vmem [resolvable:$true] %s54_s23 }
  0x38   :  { %s1399_s27 = scalar_lea.hbm %s1880_s0, 384 }
  0x39   :  { %p1400_p10 = scmp.ne.s32.totalorder %s1880_s0, %s1399_s27  ;;  %p1403_p11 = scmp.lt.u32.totalorder %s1399_s27, %s1880_s0 }
  0x3b   :  { %p1405_p12 = pnand %p1403_p11, %p1400_p10 }
  0x3d   :  { %1408 = shalt.err (!%p1405_p12)
}
  0x3e   :  { %s1409_s9 = scalar_lea.vmem %s30_s2, 384  ;;  %p1414_p0 = scmp.lt.s32.totalorder %s30_s2, %s30_s2 }
  0x3f   :  { %p1410_p13 = scmp.ne.s32.totalorder %s30_s2, %s1409_s9  ;;  %p1415_p1 = scmp.lt.s32.totalorder %s1409_s9, %s1409_s9 }
  0x41   :  { %p1416_p2 = por %p1415_p1, %p1414_p0 }
  0x43   :  { %p1417_p3 = pnand %p1416_p2, %p1410_p13 }
  0x45   :  { %1420 = shalt.err (!%p1417_p3)
}
  0x46   :  { %35 = dma.hbm_to_vmem [thread:$0]  %s1880_s0, 384, %s30_s2, [#allocation3], %s1522_s30, %s1522_s30, %s1523_s21  }
  0x47   :  { %s1421_s26 = scalar_lea.hbm %s1883_s3, 128 }
  0x48   :  { %p1422_p4 = scmp.ne.s32.totalorder %s1883_s3, %s1421_s26  ;;  %p1425_p5 = scmp.lt.u32.totalorder %s1421_s26, %s1883_s3 }
  0x4a   :  { %p1427_p6 = pnand %p1425_p5, %p1422_p4 }
  0x4c   :  { %1430 = shalt.err (!%p1427_p6)
}
  0x4d   :  { %s1431_s27 = scalar_lea.vmem %s55_s23, 128  ;;  %p1436_p8 = scmp.lt.s32.totalorder %s55_s23, %s55_s23 }
  0x4e   :  { %p1432_p7 = scmp.ne.s32.totalorder %s55_s23, %s1431_s27  ;;  %p1437_p9 = scmp.lt.s32.totalorder %s1431_s27, %s1431_s27 }
  0x50   :  { %p1438_p10 = por %p1437_p9, %p1436_p8 }
  0x52   :  { %p1439_p11 = pnand %p1438_p10, %p1432_p7 }
  0x54   :  { %1442 = shalt.err (!%p1439_p11)
}
  0x55   :  { %57 = dma.hbm_to_vmem [thread:$0]  %s1883_s3, 128, %s55_s23, [#allocation6]  }
  0x56   :  { %s1526_s29 = smov [#allocation10]   ;;  %s1527_s16 = smov [#allocation13]  }
  0x57   :  { %s82_s15 = sshll.u32 %s1526_s29, 4  ;;  %s103_s17 = sshll.u32 %s1527_s16, 4  ;;  %s83_s15 = int_to_ptr.vmem [resolvable:$true] %s82_s15  ;;  %s104_s17 = int_to_ptr.vmem [resolvable:$true] %s103_s17 }
  0x58   :  { %s1443_s18 = scalar_lea.hbm %s1888_s8, 16 }
  0x59   :  { %p1444_p12 = scmp.ne.s32.totalorder %s1888_s8, %s1443_s18  ;;  %p1447_p13 = scmp.lt.u32.totalorder %s1443_s18, %s1888_s8 }
  0x5b   :  { %p1449_p0 = pnand %p1447_p13, %p1444_p12 }
  0x5d   :  { %1452 = shalt.err (!%p1449_p0)
}
  0x5e   :  { %s1453_s3 = scalar_lea.vmem %s83_s15, 16  ;;  %s1457_s23 = scalar_lea.vmem %s83_s15, 32 }
  0x5f   :  { %p1454_p1 = scmp.ne.s32.totalorder %s83_s15, %s1453_s3  ;;  %p1458_p2 = scmp.lt.s32.totalorder %s83_s15, %s83_s15 }
  0x60   :  { %p1459_p3 = scmp.lt.s32.totalorder %s1457_s23, %s1453_s3 }
  0x62   :  { %p1460_p4 = por %p1459_p3, %p1458_p2 }
  0x64   :  { %p1461_p5 = pnand %p1460_p4, %p1454_p1 }
  0x66   :  { %1464 = shalt.err (!%p1461_p5)
}
  0x67   :  { %85 = dma.hbm_to_vmem [thread:$0]  %s1888_s8, 16, %s83_s15, [#allocation9]  }
  0x68   :  { %s1465_s0 = scalar_lea.hbm %s1891_s11, 512 }
  0x69   :  { %p1466_p6 = scmp.ne.s32.totalorder %s1891_s11, %s1465_s0  ;;  %p1469_p7 = scmp.lt.u32.totalorder %s1465_s0, %s1891_s11 }
  0x6b   :  { %p1471_p8 = pnand %p1469_p7, %p1466_p6 }
  0x6d   :  { %1474 = shalt.err (!%p1471_p8)
}
  0x6e   :  { %s1475_s28 = scalar_lea.vmem %s104_s17, 512  ;;  %p1480_p10 = scmp.lt.s32.totalorder %s104_s17, %s104_s17 }
  0x6f   :  { %p1476_p9 = scmp.ne.s32.totalorder %s104_s17, %s1475_s28  ;;  %p1481_p11 = scmp.lt.s32.totalorder %s1475_s28, %s1475_s28 }
  0x71   :  { %p1482_p12 = por %p1481_p11, %p1480_p10 }
  0x73   :  { %p1483_p13 = pnand %p1482_p12, %p1476_p9 }
  0x75   :  { %1486 = shalt.err (!%p1483_p13)
}
  0x76   :  { %109 = dma.hbm_to_vmem [thread:$0]  %s1891_s11, 512, %s104_s17, [#allocation12], %s1522_s30, %s1522_s30, %s1523_s21  }
  0x77   :  { %1509 = dma.done.wait [#allocation3], 384  }
  0x78   :  { %1510 = vsyncadd [#allocation3], 4294966912 }
  0x79   :  { %1511 = dma.done.wait [#allocation6], 256  }
  0x7a   :  { %1512 = vsyncadd [#allocation6], 4294967040 }
  0x7b   :  { %1513 = dma.done.wait [#allocation9], 528  }
  0x7c   :  { %1514 = vsyncadd [#allocation9], 4294966768 }
  0x7d   :  { %1515 = dma.done.wait [#allocation12], 528  }
  0x7e   :  { %1516 = vsyncadd [#allocation12], 4294966768  ;;  %v1528_v0 = vmov 0.0|0.0   ;;  %vm1529_vm0 = vmmov 0   ;;  %v1530_v1 = vmov 0.0   ;;  %v138_v2 = vld [vmem:[%s1881_s1] sm:$0xff] }
  0x7f   :  { %1255 = vmatprep.subr.bf16.mxu0 %v1528_v0  ;;  %1126 = vmatprep.mubr.msk.f32.mxu0 %vm1529_vm0, %v1530_v1  ;;  %v139_v3 = vld [vmem:[%s1881_s1 + $0x8] sm:$0xff]  ;;  %v140_v5 = vld [vmem:[%s1881_s1 + $0x10] sm:$0xff]  ;;  %v1716_v6 = vld [vmem:[#allocation2] sm:$0xff]  ;;  %vm141_vm1 = vcmask 195584   ;;  %vm241_vm2 = vcmask 64512   ;;  %vm534_vm3 = vcmask 261120  }
  0x80   :  { %1135 = vmatprep.subr.mxu1 %v1530_v1  ;;  %1137 = vmatprep.mubr.msk.f32.mxu1 %vm1529_vm0, %v1530_v1  ;;  %v1256_v4 = vpack.c.bf16 %v139_v3, %v138_v2  ;;  %v1723_v7 = vld [vmem:[#allocation2 + $0x8] sm:$0xff]  ;;  %v1729_v8 = vld [vmem:[#allocation2 + $0x10] sm:$0xff]  ;;  %v231_v9 = vld [vmem:[#allocation5] sm:$0xff] }
  0x81   :  { %1136 = vmatpush3.msra.mxu1 %v231_v9  ;;  %v232_v10 = vld [vmem:[#allocation7] sm:$0xff]  ;;  %v519_v18 = vld [vmem:[%s1886_s6 + $0x8] sm:$0xff]  ;;  %v520_v20 = vld [vmem:[%s1886_s6 + $0x10] sm:$0xff] }
  0x82   :  { %1257 = vmatpush3.bf16.msra.mxu0 %v1256_v4  ;;  %1146 = vmatprep.subr.mxu1 %v1530_v1  ;;  %v518_v17 = vld [vmem:[%s1886_s6] sm:$0xff]  ;;  %v521_v21 = vld [vmem:[%s1886_s6 + $0x18] sm:$0xff]  ;;  %v522_v58 = vld [vmem:[#allocation8] sm:$0xff] }
  0x83   :  { %1124 = vmatprep.subr.mxu0 %v1530_v1  ;;  %v1262_v19 = vpack.c.bf16 %v519_v18, %v518_v17  ;;  %v1265_v22 = vpack.c.bf16 %v521_v21, %v520_v20  ;;  %v1033_v29 = vld [vmem:[%s1885_s5] ss:$0 sm:$0xff]  ;;  %v523_v59 = vld [vmem:[#allocation8 + $0x8] sm:$0xff]  ;;  %v524_v62 = vld [vmem:[#allocation8 + $0x10] sm:$0xff] }
  0x84   :  { %v1029_v47 = vld [vmem:[%s1884_s4] ss:$0 sm:$0xff]  ;;  %v1268_v61 = vpack.c.bf16 %v523_v59, %v522_v58  ;;  %v1047_v18 = vld [vmem:[#allocation11] ss:$0 sm:$0xff] }
  0x85   :  { %v525_v63 = vld [vmem:[#allocation8 + $0x18] sm:$0xff] }
  0x86   :  { %1125 = vmatpush3.msra.mxu0 %v140_v5  ;;  %v1271_v2 = vpack.c.bf16 %v525_v63, %v524_v62  ;;  %v819_v58 = vld [vmem:[#allocation13 + $0x18] sm:$0xff] }
  0x87   :  { %1127 = vmatmul.mubr.msk.f32.vlgmr.msra.gmra.mrb[0].mxu0 %vm141_vm1, %v1716_v6  ;;  %1258 = vmatprep.subr.bf16.mxu0 %v1528_v0 }
  0x88   :  { %1129 = vmatprep.mubr.msk.f32.mxu0 %vm1529_vm0, %v1530_v1 }
  0x8b   :  { %1130 = vmatmul.mubr.msk.f32.gmra.mrb[2].mxu0 %vm141_vm1, %v1723_v7 }
  0x8c   :  { %1132 = vmatprep.mubr.msk.f32.mxu0 %vm1529_vm0, %v1530_v1 }
  0x8f   :  { %1133 = vmatmul.mubr.msk.f32.gmra.mrb[4].mxu0 %vm141_vm1, %v1729_v8 }
  0x90   :  { %1163 = vmatprep.mubr.msk.f32.mxu0 %vm1529_vm0, %v1530_v1 }
 0x15a   :  { %v217_v11 = vpop.f32.mrb[0].mxu0 }
 0x15b   :  { %v1128_v12 = vpop.f32.mrb[1].mxu0  ;;  %1138 = vmatmul.mubr.msk.f32.vlgmr.msra.gmra.mrb[0].mxu1 %vm241_vm2, %v217_v11 }
 0x15c   :  { %1140 = vmatprep.mubr.msk.f32.mxu1 %vm1529_vm0, %v1530_v1  ;;  %1147 = vmatpush3.msra.mxu1 %v232_v10  ;;  %v812_v12 = vld [vmem:[%s1890_s10] sm:$0xff] }
 0x15d   :  { %1261 = vmatprep.subr.bf16.mxu1 %v1528_v0 }
 0x15e   :  { %v222_v13 = vpop.f32.mrb[2].mxu0 }
 0x15f   :  { %v1131_v14 = vpop.f32.mrb[3].mxu0  ;;  %1141 = vmatmul.mubr.msk.f32.gmra.mrb[2].mxu1 %vm241_vm2, %v222_v13 }
 0x160   :  { %1143 = vmatprep.mubr.msk.f32.mxu1 %vm1529_vm0, %v1530_v1  ;;  %v814_v14 = vld [vmem:[%s1890_s10 + $0x10] sm:$0xff] }
 0x162   :  { %v227_v15 = vpop.f32.mrb[4].mxu0 }
 0x163   :  { %v1134_v16 = vpop.f32.mrb[5].mxu0  ;;  %1144 = vmatmul.mubr.msk.f32.gmra.mrb[4].mxu1 %vm241_vm2, %v227_v15 }
 0x164   :  { %1148 = vmatprep.mubr.msk.f32.mxu1 %vm1529_vm0, %v1530_v1  ;;  %v815_v16 = vld [vmem:[%s1890_s10 + $0x18] sm:$0xff] }
 0x165   :  { %v1280_v17 = vpack.c.bf16 %v815_v16, %v814_v14 }
 0x167   :  { %1149 = vmatmul.mubr.msk.f32.vlgmr.msra.gmra.mrb[6].mxu1 %vm241_vm2, %v217_v11 }
 0x168   :  { %1151 = vmatprep.mubr.msk.f32.mxu1 %vm1529_vm0, %v1530_v1  ;;  %1263 = vmatpush3.bf16.msra.mxu1 %v1262_v19 }
 0x169   :  { %1264 = vmatprep.subr.bf16.mxu1 %v1528_v0 }
 0x16b   :  { %1152 = vmatmul.mubr.msk.f32.gmra.mrb[8].mxu1 %vm241_vm2, %v222_v13  ;;  %v813_v13 = vld [vmem:[%s1890_s10 + $0x8] sm:$0xff] }
 0x16c   :  { %1154 = vmatprep.mubr.msk.f32.mxu1 %vm1529_vm0, %v1530_v1  ;;  %1266 = vmatpush3.bf16.msra.mxu1 %v1265_v22 }
 0x16d   :  { %1273 = vmatprep.subr.bf16.mxu1 %v1528_v0 }
 0x16f   :  { %1155 = vmatmul.mubr.msk.f32.gmra.mrb[10].mxu1 %vm241_vm2, %v227_v15  ;;  %v1277_v15 = vpack.c.bf16 %v813_v13, %v812_v12 }
 0x170   :  { %1180 = vmatprep.mubr.msk.f32.mxu1 %vm1529_vm0, %v1530_v1 }
 0x22e   :  { %v317_v23 = vpop.f32.mrb[0].mxu1 }
 0x22f   :  { %v1139_v24 = vpop.f32.mrb[1].mxu1  ;;  %v318_v49 = vadd.f32 %v1029_v47, %v317_v23 }
 0x232   :  { %v322_v25 = vpop.f32.mrb[2].mxu1 }
 0x233   :  { %v1142_v26 = vpop.f32.mrb[3].mxu1  ;;  %v323_v52 = vadd.f32 %v1029_v47, %v322_v25 }
 0x236   :  { %v327_v27 = vpop.f32.mrb[4].mxu1 }
 0x237   :  { %v1145_v28 = vpop.f32.mrb[5].mxu1  ;;  %v328_v55 = vadd.f32 %v1029_v47, %v327_v27 }
 0x23a   :  { %v403_v30 = vpop.f32.mrb[6].mxu1 }
 0x23b   :  { %v404_v31 = vadd.f32 %v1033_v29, %v403_v30  ;;  %v1150_v32 = vpop.f32.mrb[7].mxu1 }
 0x23d   :  { %v1037_v33 = vmul.f32 -1.442695, %v404_v31 }
 0x23e   :  { %v408_v34 = vpop.f32.mrb[8].mxu1 }
 0x23f   :  { %1305 = vpow2.f32 %v1037_v33  ;;  %v409_v35 = vadd.f32 %v1033_v29, %v408_v34  ;;  %v1153_v36 = vpop.f32.mrb[9].mxu1 }
 0x241   :  { %v1038_v37 = vmul.f32 -1.442695, %v409_v35 }
 0x242   :  { %v413_v38 = vpop.f32.mrb[10].mxu1 }
 0x243   :  { %1307 = vpow2.f32 %v1038_v37  ;;  %v414_v39 = vadd.f32 %v1033_v29, %v413_v38  ;;  %v1156_v40 = vpop.f32.mrb[11].mxu1 }
 0x245   :  { %v1039_v41 = vmul.f32 -1.442695, %v414_v39 }
 0x247   :  { %1309 = vpow2.f32 %v1039_v41 }
 0x249   :  { %v1306_v42 = vpop.eup %1305 }
 0x24a   :  { %v426_v43 = vadd.f32 1.0, %v1306_v42  ;;  %v1043_v42 = vld [vmem:[#allocation10] ss:$0 sm:$0xff] }
 0x24c   :  { %1311 = vrcp.f32 %v426_v43 }
 0x24d   :  { %v1308_v44 = vpop.eup %1307 }
 0x24e   :  { %v427_v45 = vadd.f32 1.0, %v1308_v44 }
 0x250   :  { %1313 = vrcp.f32 %v427_v45 }
 0x251   :  { %v1310_v46 = vpop.eup %1309 }
 0x252   :  { %v428_v48 = vadd.f32 1.0, %v1310_v46 }
 0x254   :  { %1315 = vrcp.f32 %v428_v48 }
 0x256   :  { %v1312_v50 = vpop.eup %1311 }
 0x257   :  { %v435_v51 = vmul.f32 %v1312_v50, %v318_v49 }
 0x25a   :  { %v1314_v53 = vpop.eup %1313 }
 0x25b   :  { %v1775_v54 = vmul.f32 %v1314_v53, %v323_v52  ;;  %v816_v53 = vld [vmem:[#allocation13] sm:$0xff] }
 0x25d   :  { %v1259_v56 = vpack.c.bf16 %v1775_v54, %v435_v51 }
 0x25e   :  { %v1316_v57 = vpop.eup %1315 }
 0x25f   :  { %1260 = vmatpush3.bf16.msra.mxu0 %v1259_v56  ;;  %v437_v60 = vmul.f32 %v1316_v57, %v328_v55  ;;  %v817_v55 = vld [vmem:[#allocation13 + $0x8] sm:$0xff] }
 0x260   :  { %1161 = vmatprep.subr.mxu0 %v1530_v1  ;;  %v1283_v57 = vpack.c.bf16 %v817_v55, %v816_v53 }
 0x263   :  { %1162 = vmatpush3.msra.mxu0 %v437_v60 }
 0x264   :  { %1164 = vmatmul.mubr.msk.f32.vlgmr.msra.gmra.mrb[6].mxu0 %vm141_vm1, %v1716_v6  ;;  %1267 = vmatprep.subr.bf16.mxu0 %v1528_v0 }
 0x265   :  { %1166 = vmatprep.mubr.msk.f32.mxu0 %vm1529_vm0, %v1530_v1  ;;  %1269 = vmatpush3.bf16.msra.mxu0 %v1268_v61 }
 0x266   :  { %1270 = vmatprep.subr.bf16.mxu0 %v1528_v0 }
 0x268   :  { %1167 = vmatmul.mubr.msk.f32.gmra.mrb[8].mxu0 %vm141_vm1, %v1723_v7 }
 0x269   :  { %1169 = vmatprep.mubr.msk.f32.mxu0 %vm1529_vm0, %v1530_v1  ;;  %1272 = vmatpush3.bf16.msra.mxu0 %v1271_v2 }
 0x26a   :  { %1276 = vmatprep.subr.bf16.mxu0 %v1528_v0 }
 0x26c   :  { %1170 = vmatmul.mubr.msk.f32.gmra.mrb[10].mxu0 %vm141_vm1, %v1729_v8 }
 0x26d   :  { %1197 = vmatprep.mubr.msk.f32.mxu0 %vm1529_vm0, %v1530_v1 }
 0x337   :  { %v504_v3 = vpop.f32.mrb[6].mxu0 }
 0x338   :  { %v1165_v4 = vpop.f32.mrb[7].mxu0  ;;  %1181 = vmatmul.mubr.msk.f32.vlgmr.msra.gmra.mrb[12].mxu1 %vm534_vm3, %v504_v3  ;;  %1198 = vmatmul.mubr.msk.f32.vlgmr.msra.gmra.mrb[12].mxu0 %vm534_vm3, %v504_v3  ;;  %v1061_v3 = vld [vmem:[%s1893_s13] ss:$0 sm:$0xff]  ;;  %s1531_s13 = smov [#allocation14]  }
 0x339   :  { %1183 = vmatprep.mubr.msk.f32.mxu1 %vm1529_vm0, %v1530_v1  ;;  %1200 = vmatprep.mubr.msk.f32.mxu0 %vm1529_vm0, %v1530_v1  ;;  %s1014_s21 = sshll.u32 %s1531_s13, 4  ;;  %s1015_s21 = int_to_ptr.vmem [resolvable:$true] %s1014_s21 }
 0x33a   :  { %1278 = vmatpush3.bf16.msra.mxu0 %v1277_v15  ;;  %s1487_s17 = scalar_lea.vmem %s1015_s21, 128  ;;  %p1492_p1 = scmp.lt.s32.totalorder %s1015_s21, %s1015_s21 }
 0x33b   :  { %v509_v5 = vpop.f32.mrb[8].mxu0  ;;  %1279 = vmatprep.subr.bf16.mxu0 %v1528_v0  ;;  %p1488_p0 = scmp.ne.s32.totalorder %s1015_s21, %s1487_s17  ;;  %p1493_p2 = scmp.lt.s32.totalorder %s1487_s17, %s1487_s17 }
 0x33c   :  { %v1168_v9 = vpop.f32.mrb[9].mxu0  ;;  %1184 = vmatmul.mubr.msk.f32.gmra.mrb[14].mxu1 %vm534_vm3, %v509_v5  ;;  %1201 = vmatmul.mubr.msk.f32.gmra.mrb[14].mxu0 %vm534_vm3, %v509_v5 }
 0x33d   :  { %1203 = vmatprep.mubr.msk.f32.mxu0 %vm1529_vm0, %v1530_v1  ;;  %1186 = vmatprep.mubr.msk.f32.mxu1 %vm1529_vm0, %v1530_v1  ;;  %p1494_p3 = por %p1493_p2, %p1492_p1 }
 0x33e   :  { %1281 = vmatpush3.bf16.msra.mxu0 %v1280_v17 }
 0x33f   :  { %v514_v10 = vpop.f32.mrb[10].mxu0  ;;  %1282 = vmatprep.subr.bf16.mxu0 %v1528_v0  ;;  %p1495_p4 = pnand %p1494_p3, %p1488_p0 }
 0x340   :  { %1204 = vmatmul.mubr.msk.f32.gmra.mrb[16].mxu0 %vm534_vm3, %v514_v10  ;;  %v1171_v11 = vpop.f32.mrb[11].mxu0  ;;  %1187 = vmatmul.mubr.msk.f32.gmra.mrb[16].mxu1 %vm534_vm3, %v514_v10 }
 0x341   :  { %1212 = vmatprep.mubr.msk.f32.mxu1 %vm1529_vm0, %v1530_v1  ;;  %1229 = vmatprep.mubr.msk.f32.mxu0 %vm1529_vm0, %v1530_v1 }
 0x40b   :  { %v610_v19 = vpop.f32.mrb[12].mxu1  ;;  %v696_v20 = vpop.f32.mrb[12].mxu0 }
 0x40c   :  { %v697_v21 = vadd.f32 %v1047_v18, %v696_v20  ;;  %v1182_v22 = vpop.f32.mrb[13].mxu1  ;;  %v1199_v23 = vpop.f32.mrb[13].mxu0  ;;  %v611_v44 = vadd.f32 %v1043_v42, %v610_v19  ;;  %v1057_v20 = vld [vmem:[%s1892_s12] ss:$0 sm:$0xff] }
 0x40e   :  { %v1051_v24 = vmul.f32 -1.442695, %v697_v21 }
 0x40f   :  { %v615_v25 = vpop.f32.mrb[14].mxu1  ;;  %v701_v26 = vpop.f32.mrb[14].mxu0 }
 0x410   :  { %1317 = vpow2.f32 %v1051_v24  ;;  %v702_v27 = vadd.f32 %v1047_v18, %v701_v26  ;;  %v1185_v28 = vpop.f32.mrb[15].mxu1  ;;  %v1202_v29 = vpop.f32.mrb[15].mxu0  ;;  %v616_v47 = vadd.f32 %v1043_v42, %v615_v25 }
 0x412   :  { %v1052_v30 = vmul.f32 -1.442695, %v702_v27 }
 0x413   :  { %v706_v31 = vpop.f32.mrb[16].mxu0  ;;  %v620_v32 = vpop.f32.mrb[16].mxu1 }
 0x414   :  { %1319 = vpow2.f32 %v1052_v30  ;;  %v707_v33 = vadd.f32 %v1047_v18, %v706_v31  ;;  %v1188_v34 = vpop.f32.mrb[17].mxu1  ;;  %v1205_v35 = vpop.f32.mrb[17].mxu0  ;;  %v621_v50 = vadd.f32 %v1043_v42, %v620_v32 }
 0x416   :  { %v1053_v36 = vmul.f32 -1.442695, %v707_v33 }
 0x418   :  { %1321 = vpow2.f32 %v1053_v36 }
 0x41a   :  { %v1318_v37 = vpop.eup %1317 }
 0x41b   :  { %v719_v38 = vadd.f32 1.0, %v1318_v37 }
 0x41d   :  { %1323 = vrcp.f32 %v719_v38 }
 0x41e   :  { %v1320_v39 = vpop.eup %1319 }
 0x41f   :  { %v720_v40 = vadd.f32 1.0, %v1320_v39 }
 0x421   :  { %1325 = vrcp.f32 %v720_v40 }
 0x422   :  { %v1322_v41 = vpop.eup %1321 }
 0x423   :  { %v721_v43 = vadd.f32 1.0, %v1322_v41 }
 0x425   :  { %1327 = vrcp.f32 %v721_v43 }
 0x427   :  { %v1324_v45 = vpop.eup %1323 }
 0x428   :  { %v728_v46 = vmul.f32 %v1324_v45, %v611_v44 }
 0x42b   :  { %v1326_v48 = vpop.eup %1325 }
 0x42c   :  { %v1826_v49 = vmul.f32 %v1326_v48, %v616_v47 }
 0x42e   :  { %v1274_v51 = vpack.c.bf16 %v1826_v49, %v728_v46  ;;  %v731_v23 = vmax.f32 %v1775_v54, %v1826_v49 }
 0x42f   :  { %v1328_v52 = vpop.eup %1327 }
 0x430   :  { %v730_v56 = vmul.f32 %v1328_v52, %v621_v50  ;;  %1275 = vmatpush3.bf16.msra.mxu1 %v1274_v51 }
 0x431   :  { %1210 = vmatprep.subr.mxu1 %v1530_v1 }
 0x434   :  { %1211 = vmatpush3.msra.mxu1 %v730_v56 }
 0x435   :  { %1213 = vmatmul.mubr.msk.f32.vlgmr.msra.gmra.mrb[18].mxu1 %vm141_vm1, %v1716_v6  ;;  %1288 = vmatprep.subr.bf16.mxu1 %v1528_v0  ;;  %v818_v6 = vld [vmem:[#allocation13 + $0x10] sm:$0xff] }
 0x436   :  { %1215 = vmatprep.mubr.msk.f32.mxu1 %vm1529_vm0, %v1530_v1  ;;  %1290 = vmatpush3.bf16.msra.mxu1 %v1283_v57  ;;  %v1286_v59 = vpack.c.bf16 %v819_v58, %v818_v6 }
 0x437   :  { %1289 = vmatprep.subr.bf16.mxu1 %v1528_v0 }
 0x439   :  { %1216 = vmatmul.mubr.msk.f32.gmra.mrb[20].mxu1 %vm141_vm1, %v1723_v7 }
 0x43a   :  { %1218 = vmatprep.mubr.msk.f32.mxu1 %vm1529_vm0, %v1530_v1  ;;  %1291 = vmatpush3.bf16.msra.mxu1 %v1286_v59 }
 0x43d   :  { %1219 = vmatmul.mubr.msk.f32.gmra.mrb[22].mxu1 %vm141_vm1, %v1729_v8 }
 0x43e   :  { %1249 = vmatprep.mubr.msk.f32.mxu1 %vm1529_vm0, %v1530_v1 }
 0x508   :  { %v798_v60 = vpop.f32.mrb[18].mxu1 }
 0x509   :  { %1230 = vmatmul.mubr.msk.f32.vlgmr.msra.gmra.mrb[18].mxu0 %vm534_vm3, %v798_v60  ;;  %v1214_v61 = vpop.f32.mrb[19].mxu1 }
 0x50a   :  { %1232 = vmatprep.mubr.msk.f32.mxu0 %vm1529_vm0, %v1530_v1  ;;  %1284 = vmatpush3.bf16.msra.mxu0 %v1283_v57 }
 0x50b   :  { %1285 = vmatprep.subr.bf16.mxu0 %v1528_v0 }
 0x50c   :  { %v803_v7 = vpop.f32.mrb[20].mxu1 }
 0x50d   :  { %1233 = vmatmul.mubr.msk.f32.gmra.mrb[20].mxu0 %vm534_vm3, %v803_v7  ;;  %1250 = vmatmul.mubr.msk.f32.vlgmr.msra.gmra.mrb[24].mxu1 %vm534_vm3, %v803_v7  ;;  %v1217_v8 = vpop.f32.mrb[21].mxu1 }
 0x50e   :  { %1235 = vmatprep.mubr.msk.f32.mxu0 %vm1529_vm0, %v1530_v1  ;;  %1287 = vmatpush3.bf16.msra.mxu0 %v1286_v59 }
 0x50f   :  { %1252 = vmatprep.mubr.msk.f32.mxu1 %vm1529_vm0, %v1530_v1 }
 0x510   :  { %v808_v62 = vpop.f32.mrb[22].mxu1 }
 0x511   :  { %1236 = vmatmul.mubr.msk.f32.gmra.mrb[22].mxu0 %vm534_vm3, %v808_v62  ;;  %v1220_v63 = vpop.f32.mrb[23].mxu1  ;;  %1253 = vmatmul.mubr.msk.f32.gmra.mrb[26].mxu1 %vm534_vm3, %v808_v62 }
 0x512   :  { %1246 = vmatprep.mubr.msk.f32.mxu0 %vm1529_vm0, %v1530_v1 }
 0x515   :  { %1247 = vmatmul.mubr.msk.f32.vlgmr.msra.gmra.mrb[24].mxu0 %vm534_vm3, %v798_v60 }
 0x5dc   :  { %v903_v0 = vpop.f32.mrb[18].mxu0 }
 0x5dd   :  { %v1231_v2 = vpop.f32.mrb[19].mxu0 }
 0x5e0   :  { %v991_v4 = vpop.f32.mrb[24].mxu1  ;;  %v907_v5 = vpop.f32.mrb[20].mxu0 }
 0x5e1   :  { %v992_v9 = vadd.f32 %v1061_v3, %v991_v4  ;;  %v1234_v10 = vpop.f32.mrb[21].mxu0  ;;  %v1251_v11 = vpop.f32.mrb[25].mxu1  ;;  %v908_v21 = vadd.f32 %v1057_v20, %v907_v5 }
 0x5e3   :  { %v1065_v12 = vmul.f32 -1.442695, %v992_v9 }
 0x5e4   :  { %v912_v13 = vpop.f32.mrb[22].mxu0  ;;  %v996_v14 = vpop.f32.mrb[26].mxu1 }
 0x5e5   :  { %1329 = vpow2.f32 %v1065_v12  ;;  %v1237_v15 = vpop.f32.mrb[23].mxu0  ;;  %v1254_v16 = vpop.f32.mrb[27].mxu1 }
 0x5e8   :  { %v987_v1 = vpop.f32.mrb[24].mxu0 }
 0x5e9   :  { %v1248_v17 = vpop.f32.mrb[25].mxu0 }
 0x5ef   :  { %v1330_v18 = vpop.eup %1329 }
 0x5f0   :  { %v1002_v19 = vadd.f32 1.0, %v1330_v18 }
 0x5f2   :  { %1331 = vrcp.f32 %v1002_v19 }
 0x5fc   :  { %v1332_v22 = vpop.eup %1331 }
 0x5fd   :  { %v1005_v24 = vmul.f32 %v1332_v22, %v908_v21 }
 0x5ff   :  { %v1006_v25 = vmax.f32 %v731_v23, %v1005_v24 }
 0x601   :  { %1007 = vst.msk [vmem:[#allocation14] sm:$0xff] %vm534_vm3, %v1006_v25 }
 0x602   :  { %1498 = shalt.err (!%p1495_p4)
}
 0x603   :  { %s1499_s19 = scalar_lea.hbm %s1894_s14, 128 }
 0x604   :  { %p1500_p5 = scmp.ne.s32.totalorder %s1894_s14, %s1499_s19  ;;  %p1503_p6 = scmp.lt.u32.totalorder %s1499_s19, %s1894_s14 }
 0x606   :  { %p1505_p7 = pnand %p1503_p6, %p1500_p5 }
 0x608   :  { %1508 = shalt.err (!%p1505_p7)
}
 0x609   :  { %1017 = dma.vmem_to_hbm [thread:$0]  %s1015_s21, 128, %s1894_s14, [#allocation4]  }
 0x60a   :  { %1517 = dma.done.wait [#allocation4], 128  }
 0x60b   :  { %1518 = vsyncadd [#allocation4], 4294967168 }
 0x60c   :  { %1021 = vsyncpa [#allocation3], 1 }
 0x60d   :  { %1022 = vsyncpa [#allocation6], 1 }
 0x60e   :  { %1023 = vsyncpa [#allocation9], 1 }
 0x60f   :  { %1024 = vsyncpa [#allocation12], 1 }
 0x610   :  { %1025 = vsyncpa [#allocation4], 1 }

</bundles_post_ra>
